<compile_context>
chip_gen: v5e
topology: v5e:2x2
jax: 0.10.0
libtpu: 0.0.40
codegen_flags: <defaults>
</compile_context>

<pallas_src>
import jax
import jax.numpy as jnp
from jax.experimental import pallas as pl
from jax.experimental.pallas import tpu as pltpu

_ROW_ALIGN = 8          # f32 sublane granularity for batch tiles
_TB_MAX = 4096          # hard cap on rows per tile
_VMEM_BUDGET = 16 * 1024 * 1024   # working-set budget used to size the tile
_VMEM_LIMIT = 32 * 1024 * 1024    # explicit scoped-VMEM limit (>= v5e default)


def _round_up(n, m):
    return ((n + m - 1) // m) * m


def _tensorcore_count():
    """Best-effort TensorCores-per-chip (2 on v7x, else 1)."""
    try:
        d = jax.devices()[0]
        n = getattr(d, "num_cores", None)
        if n is not None:
            return max(int(n), 1)
        kind = str(getattr(d, "device_kind", "")).lower()
        return 2 if "v7" in kind else 1
    except Exception:
        return 1


def _mlp_kernel(x_ref, w1, b1, w2, b2, w3, b3, w4, b4, o_ref):
    # Cast the f32 input tile to bf16 on the VPU (hidden under the MXU).
    x = x_ref[...].astype(w1.dtype)
    # Layers 1-3: Linear (BN pre-folded) -> ReLU -> Dropout(identity).
    h = jnp.dot(x, w1[...], preferred_element_type=jnp.float32) + b1[...]
    h = jnp.maximum(h, 0.0)
    h = jnp.dot(h.astype(w2.dtype), w2[...], preferred_element_type=jnp.float32) + b2[...]
    h = jnp.maximum(h, 0.0)
    h = jnp.dot(h.astype(w3.dtype), w3[...], preferred_element_type=jnp.float32) + b3[...]
    h = jnp.maximum(h, 0.0)
    # Layer 4: Linear(32, num_classes)
    out = jnp.dot(h.astype(w4.dtype), w4[...], preferred_element_type=jnp.float32) + b4[...]
    o_ref[...] = out.astype(o_ref.dtype)


def fold_params(raw, *, eps=1e-5, compute_dtype=jnp.bfloat16):
    """Fold inference-mode BatchNorm1d into the preceding Linear and cast the
    MXU operands (weights) to bf16.  Biases stay f32 (f32 VPU adds)."""
    folded = {}
    for li in (1, 2, 3):
        scale = raw[f"gamma{li}"] / jnp.sqrt(raw[f"var{li}"] + eps)
        shift = raw[f"beta{li}"] - raw[f"mean{li}"] * scale
        folded[f"w{li}"] = (raw[f"w{li}"] * scale[None, :]).astype(compute_dtype)
        folded[f"b{li}"] = (raw[f"b{li}"] * scale + shift)[None, :].astype(jnp.float32)
    folded["w4"] = raw["w4"].astype(compute_dtype)
    folded["b4"] = raw["b4"][None, :].astype(jnp.float32)
    return folded


def _pick_tiling(B, F, h1, h2, h3, C):
    """Batch-tile size + grid length from a per-generation-safe VMEM budget."""
    # Per-row VMEM working set (bytes): up to triple-buffered f32 input tile,
    # its bf16 copy, f32+bf16 intermediates, double-buffered f32 output tile.
    per_row = 3 * F * 4 + F * 2 + (h1 + h2 + h3) * 6 + 2 * C * 4
    tb_budget = max((_VMEM_BUDGET // max(per_row, 1)) // _ROW_ALIGN * _ROW_ALIGN,
                    _ROW_ALIGN)
    tb_cap = min(_TB_MAX, tb_budget, _round_up(B, _ROW_ALIGN))

    # Only split the batch across 2 tiles when there are 2 TensorCores (v7x)
    # and each half is big enough to amortize the per-step overhead.
    min_tiles = 2 if (_tensorcore_count() >= 2 and B >= 512) else 1

    num_tiles = max(pl.cdiv(B, tb_cap), min_tiles)
    tb_eff = _round_up(pl.cdiv(B, num_tiles), _ROW_ALIGN)
    num_tiles = pl.cdiv(B, tb_eff)
    return tb_eff, num_tiles


def foodprox_forward(x, folded):
    """Fused FoodProXNN eval-mode forward.  x: [B, input_size] float32."""
    B, F = x.shape
    h1 = folded["w1"].shape[1]
    h2 = folded["w2"].shape[1]
    h3 = folded["w3"].shape[1]
    C = folded["w4"].shape[1]

    tb_eff, num_tiles = _pick_tiling(B, F, h1, h2, h3, C)

    # Whole-array parameter specs (constant index map -> weights stay resident
    # in VMEM across grid steps, no per-step re-DMA).
    def full_spec(shape):
        return pl.BlockSpec(shape, lambda i: tuple(0 for _ in shape))

    param_order = ["w1", "b1", "w2", "b2", "w3", "b3", "w4", "b4"]
    param_args = [folded[k] for k in param_order]
    param_specs = [full_spec(folded[k].shape) for k in param_order]

    # Deeper input pipelining only pays off when the grid is long.
    if num_tiles >= 3:
        x_spec = pl.BlockSpec((tb_eff, F), lambda i: (i, 0),
                              pipeline_mode=pl.Buffered(3))
    else:
        x_spec = pl.BlockSpec((tb_eff, F), lambda i: (i, 0))

    grid_spec = pltpu.PrefetchScalarGridSpec(
        num_scalar_prefetch=0,
        grid=(num_tiles,),
        in_specs=[x_spec] + param_specs,
        out_specs=pl.BlockSpec((tb_eff, C), lambda i: (i, 0)),
    )

    flops = 2 * B * (F * h1 + h1 * h2 + h2 * h3 + h3 * C)
    param_bytes = sum(int(folded[k].size) * folded[k].dtype.itemsize
                      for k in param_order)
    bytes_accessed = B * (4 * F + 4 * C) + param_bytes
    cost = pl.CostEstimate(flops=flops, transcendentals=0,
                           bytes_accessed=bytes_accessed)

    out = pl.pallas_call(
        _mlp_kernel,
        out_shape=jax.ShapeDtypeStruct((B, C), jnp.float32),
        grid_spec=grid_spec,
        compiler_params=pltpu.CompilerParams(
            dimension_semantics=("parallel",),
            vmem_limit_bytes=_VMEM_LIMIT),
        cost_estimate=cost,
    )(x, *param_args)
    return out


def init_params(key, input_size, num_classes=4):
    """Deterministic synthetic parameters mirroring FoodProXNN.__init__ shapes.

    Linear weights are generated directly as [in, out] (transposed vs
    PyTorch's [out, in]); BatchNorm running stats are synthetic (eval mode)."""
    dims = [(input_size, 128), (128, 64), (64, 32), (32, num_classes)]
    params = {}
    keys = jax.random.split(key, 16)
    ki = 0
    for li, (fan_in, fan_out) in enumerate(dims, start=1):
        bound = 1.0 / jnp.sqrt(fan_in)
        params[f"w{li}"] = jax.random.uniform(
            keys[ki], (fan_in, fan_out), jnp.float32, -bound, bound); ki += 1
        params[f"b{li}"] = jax.random.uniform(
            keys[ki], (fan_out,), jnp.float32, -bound, bound); ki += 1
        if li < 4:  # BatchNorm1d follows the first three Linear layers
            params[f"gamma{li}"] = 1.0 + 0.1 * jax.random.normal(
                keys[ki], (fan_out,), jnp.float32); ki += 1
            params[f"beta{li}"] = 0.1 * jax.random.normal(
                keys[ki], (fan_out,), jnp.float32); ki += 1
            params[f"mean{li}"] = 0.05 * jnp.arange(fan_out, dtype=jnp.float32)
            params[f"var{li}"] = 1.0 + 0.01 * jnp.arange(fan_out, dtype=jnp.float32)
    return params


def reference_forward(x, raw, *, eps=1e-5):
    """Plain-JAX f32 reference of the eval-mode forward (explicit BN)."""
    h = x
    for li in (1, 2, 3):
        h = h @ raw[f"w{li}"] + raw[f"b{li}"]
        h = (h - raw[f"mean{li}"]) / jnp.sqrt(raw[f"var{li}"] + eps)
        h = h * raw[f"gamma{li}"] + raw[f"beta{li}"]
        h = jnp.maximum(h, 0.0)
    return h @ raw["w4"] + raw["b4"]


def reference_forward_quantized(x, folded):
    """Reference using the same folded / bf16-quantized operands as the kernel."""
    h = x.astype(folded["w1"].dtype).astype(jnp.float32)
    for li in (1, 2, 3):
        w = folded[f"w{li}"].astype(jnp.float32)
        h = jnp.maximum(h @ w + folded[f"b{li}"], 0.0)
        h = h.astype(folded[f"w{li}"].dtype).astype(jnp.float32)
    return h @ folded["w4"].astype(jnp.float32) + folded["b4"]


if __name__ == "__main__":
    # TODO(synk): Dropout is identity and BatchNorm uses running stats here
    # (inference mode); training-mode dropout masks / batch statistics are not
    # reproduced.  bf16 MXU operands (f32 accumulation) are an intentional
    # precision choice vs the f32 PyTorch model.
    key = jax.random.PRNGKey(0)
    k_x, k_p = jax.random.split(key)

    input_size = 32
    num_classes = 4
    raw = init_params(k_p, input_size, num_classes)
    folded = fold_params(raw)

    # Main case (aligned batch) + a ragged batch to exercise the masked
    # final-block store (no jnp.pad on the hot path anymore).
    for batch in (8, 5):
        x = jax.random.normal(k_x, (batch, input_size), jnp.float32)
        out = jax.block_until_ready(foodprox_forward(x, folded))
        assert out.shape == (batch, num_classes)

        # Tight check vs a reference using the same bf16 folded params.
        ref_q = reference_forward_quantized(x, folded)
        assert jnp.allclose(out, ref_q, atol=1e-2, rtol=1e-2), \
            f"mismatch vs quantized ref (batch={batch})"

        # Looser check vs the full-f32, unfolded (Linear -> BN -> ReLU) reference.
        ref = reference_forward(x, raw)
        assert jnp.allclose(out, ref, atol=5e-2, rtol=5e-2), \
            f"mismatch vs f32 reference (batch={batch})"

    print("KERNEL_OK")
</pallas_src>

<mosaic_0001>
module attributes {stable_mosaic.version = 11 : i64} {
  func.func @_mlp_kernel(%arg0: i32, %arg1: memref<8x32xf32, #tpu.memory_space<vmem>>, %arg2: memref<32x128xbf16, #tpu.memory_space<vmem>>, %arg3: memref<1x128xf32, #tpu.memory_space<vmem>>, %arg4: memref<128x64xbf16, #tpu.memory_space<vmem>>, %arg5: memref<1x64xf32, #tpu.memory_space<vmem>>, %arg6: memref<64x32xbf16, #tpu.memory_space<vmem>>, %arg7: memref<1x32xf32, #tpu.memory_space<vmem>>, %arg8: memref<32x4xbf16, #tpu.memory_space<vmem>>, %arg9: memref<1x4xf32, #tpu.memory_space<vmem>>, %arg10: memref<8x4xf32, #tpu.memory_space<vmem>>) attributes {dimension_semantics = [#tpu.dimension_semantics<parallel>], iteration_bounds = array<i64: 1>, scalar_prefetch = 0 : i64, scratch_operands = 0 : i64, tpu.core_type = #tpu.core_type<tc>, window_params = [{transform_indices = @transform_0, window_bounds = array<i64: 8, 32>}, {pipeline_mode = #tpu.pipeline_mode<synchronous>, transform_indices = @transform_1, window_bounds = array<i64: 32, 128>}, {pipeline_mode = #tpu.pipeline_mode<synchronous>, transform_indices = @transform_2, window_bounds = array<i64: 1, 128>}, {pipeline_mode = #tpu.pipeline_mode<synchronous>, transform_indices = @transform_3, window_bounds = array<i64: 128, 64>}, {pipeline_mode = #tpu.pipeline_mode<synchronous>, transform_indices = @transform_4, window_bounds = array<i64: 1, 64>}, {pipeline_mode = #tpu.pipeline_mode<synchronous>, transform_indices = @transform_5, window_bounds = array<i64: 64, 32>}, {pipeline_mode = #tpu.pipeline_mode<synchronous>, transform_indices = @transform_6, window_bounds = array<i64: 1, 32>}, {pipeline_mode = #tpu.pipeline_mode<synchronous>, transform_indices = @transform_7, window_bounds = array<i64: 32, 4>}, {pipeline_mode = #tpu.pipeline_mode<synchronous>, transform_indices = @transform_8, window_bounds = array<i64: 1, 4>}, {transform_indices = @transform_9, window_bounds = array<i64: 8, 4>}]} {
    %c0 = arith.constant 0 : index
    %c0_0 = arith.constant 0 : index
    %0 = vector.load %arg1[%c0, %c0_0] : memref<8x32xf32, #tpu.memory_space<vmem>>, vector<8x32xf32>
    %1 = arith.truncf %0 : vector<8x32xf32> to vector<8x32xbf16>
    %c0_1 = arith.constant 0 : index
    %c0_2 = arith.constant 0 : index
    %2 = vector.load %arg2[%c0_1, %c0_2] : memref<32x128xbf16, #tpu.memory_space<vmem>>, vector<32x128xbf16>
    %cst = arith.constant dense<0.000000e+00> : vector<8x128xf32>
    %3 = tpu.matmul %1, %2, %cst {dimension_numbers = #tpu.dot_dimension_numbers<[1], [0], [0], [1], [0, 0, 1, 1], [], []>} : vector<8x32xbf16>, vector<32x128xbf16>, vector<8x128xf32> -> vector<8x128xf32>
    %c0_3 = arith.constant 0 : index
    %c0_4 = arith.constant 0 : index
    %4 = vector.load %arg3[%c0_3, %c0_4] : memref<1x128xf32, #tpu.memory_space<vmem>>, vector<1x128xf32>
    %5 = vector.broadcast %4 : vector<1x128xf32> to vector<8x128xf32>
    %6 = arith.addf %3, %5 : vector<8x128xf32>
    %cst_5 = arith.constant 0.000000e+00 : f32
    %7 = vector.broadcast %cst_5 : f32 to vector<8x128xf32>
    %8 = arith.maximumf %6, %7 : vector<8x128xf32>
    %9 = arith.truncf %8 : vector<8x128xf32> to vector<8x128xbf16>
    %c0_6 = arith.constant 0 : index
    %c0_7 = arith.constant 0 : index
    %10 = vector.load %arg4[%c0_6, %c0_7] : memref<128x64xbf16, #tpu.memory_space<vmem>>, vector<128x64xbf16>
    %cst_8 = arith.constant dense<0.000000e+00> : vector<8x64xf32>
    %11 = tpu.matmul %9, %10, %cst_8 {dimension_numbers = #tpu.dot_dimension_numbers<[1], [0], [0], [1], [0, 0, 1, 1], [], []>} : vector<8x128xbf16>, vector<128x64xbf16>, vector<8x64xf32> -> vector<8x64xf32>
    %c0_9 = arith.constant 0 : index
    %c0_10 = arith.constant 0 : index
    %12 = vector.load %arg5[%c0_9, %c0_10] : memref<1x64xf32, #tpu.memory_space<vmem>>, vector<1x64xf32>
    %13 = vector.broadcast %12 : vector<1x64xf32> to vector<8x64xf32>
    %14 = arith.addf %11, %13 : vector<8x64xf32>
    %cst_11 = arith.constant 0.000000e+00 : f32
    %15 = vector.broadcast %cst_11 : f32 to vector<8x64xf32>
    %16 = arith.maximumf %14, %15 : vector<8x64xf32>
    %17 = arith.truncf %16 : vector<8x64xf32> to vector<8x64xbf16>
    %c0_12 = arith.constant 0 : index
    %c0_13 = arith.constant 0 : index
    %18 = vector.load %arg6[%c0_12, %c0_13] : memref<64x32xbf16, #tpu.memory_space<vmem>>, vector<64x32xbf16>
    %cst_14 = arith.constant dense<0.000000e+00> : vector<8x32xf32>
    %19 = tpu.matmul %17, %18, %cst_14 {dimension_numbers = #tpu.dot_dimension_numbers<[1], [0], [0], [1], [0, 0, 1, 1], [], []>} : vector<8x64xbf16>, vector<64x32xbf16>, vector<8x32xf32> -> vector<8x32xf32>
    %c0_15 = arith.constant 0 : index
    %c0_16 = arith.constant 0 : index
    %20 = vector.load %arg7[%c0_15, %c0_16] : memref<1x32xf32, #tpu.memory_space<vmem>>, vector<1x32xf32>
    %21 = vector.broadcast %20 : vector<1x32xf32> to vector<8x32xf32>
    %22 = arith.addf %19, %21 : vector<8x32xf32>
    %cst_17 = arith.constant 0.000000e+00 : f32
    %23 = vector.broadcast %cst_17 : f32 to vector<8x32xf32>
    %24 = arith.maximumf %22, %23 : vector<8x32xf32>
    %25 = arith.truncf %24 : vector<8x32xf32> to vector<8x32xbf16>
    %c0_18 = arith.constant 0 : index
    %c0_19 = arith.constant 0 : index
    %26 = vector.load %arg8[%c0_18, %c0_19] : memref<32x4xbf16, #tpu.memory_space<vmem>>, vector<32x4xbf16>
    %cst_20 = arith.constant dense<0.000000e+00> : vector<8x4xf32>
    %27 = tpu.matmul %25, %26, %cst_20 {dimension_numbers = #tpu.dot_dimension_numbers<[1], [0], [0], [1], [0, 0, 1, 1], [], []>} : vector<8x32xbf16>, vector<32x4xbf16>, vector<8x4xf32> -> vector<8x4xf32>
    %c0_21 = arith.constant 0 : index
    %c0_22 = arith.constant 0 : index
    %28 = vector.load %arg9[%c0_21, %c0_22] : memref<1x4xf32, #tpu.memory_space<vmem>>, vector<1x4xf32>
    %29 = vector.broadcast %28 : vector<1x4xf32> to vector<8x4xf32>
    %30 = arith.addf %27, %29 : vector<8x4xf32>
    %c0_23 = arith.constant 0 : index
    %c0_24 = arith.constant 0 : index
    %31 = vector.load %arg10[%c0_23, %c0_24] : memref<8x4xf32, #tpu.memory_space<vmem>>, vector<8x4xf32>
    tpu.vector_store %arg10[%c0_23, %c0_24], %30 {strides = array<i32>} : memref<8x4xf32, #tpu.memory_space<vmem>>, vector<8x4xf32>,
    return
  }
  func.func @transform_0(%arg0: i32) -> (i32, i32) {
    %c0_i32 = arith.constant 0 : i32
    %c0_i32_0 = arith.constant 0 : i32
    return %arg0, %c0_i32 : i32, i32
  }
  func.func @transform_1(%arg0: i32) -> (i32, i32) {
    %c0_i32 = arith.constant 0 : i32
    %c0_i32_0 = arith.constant 0 : i32
    %c0_i32_1 = arith.constant 0 : i32
    return %c0_i32, %c0_i32_0 : i32, i32
  }
  func.func @transform_2(%arg0: i32) -> (i32, i32) {
    %c0_i32 = arith.constant 0 : i32
    %c0_i32_0 = arith.constant 0 : i32
    %c0_i32_1 = arith.constant 0 : i32
    return %c0_i32, %c0_i32_0 : i32, i32
  }
  func.func @transform_3(%arg0: i32) -> (i32, i32) {
    %c0_i32 = arith.constant 0 : i32
    %c0_i32_0 = arith.constant 0 : i32
    %c0_i32_1 = arith.constant 0 : i32
    return %c0_i32, %c0_i32_0 : i32, i32
  }
  func.func @transform_4(%arg0: i32) -> (i32, i32) {
    %c0_i32 = arith.constant 0 : i32
    %c0_i32_0 = arith.constant 0 : i32
    %c0_i32_1 = arith.constant 0 : i32
    return %c0_i32, %c0_i32_0 : i32, i32
  }
  func.func @transform_5(%arg0: i32) -> (i32, i32) {
    %c0_i32 = arith.constant 0 : i32
    %c0_i32_0 = arith.constant 0 : i32
    %c0_i32_1 = arith.constant 0 : i32
    return %c0_i32, %c0_i32_0 : i32, i32
  }
  func.func @transform_6(%arg0: i32) -> (i32, i32) {
    %c0_i32 = arith.constant 0 : i32
    %c0_i32_0 = arith.constant 0 : i32
    %c0_i32_1 = arith.constant 0 : i32
    return %c0_i32, %c0_i32_0 : i32, i32
  }
  func.func @transform_7(%arg0: i32) -> (i32, i32) {
    %c0_i32 = arith.constant 0 : i32
    %c0_i32_0 = arith.constant 0 : i32
    %c0_i32_1 = arith.constant 0 : i32
    return %c0_i32, %c0_i32_0 : i32, i32
  }
  func.func @transform_8(%arg0: i32) -> (i32, i32) {
    %c0_i32 = arith.constant 0 : i32
    %c0_i32_0 = arith.constant 0 : i32
    %c0_i32_1 = arith.constant 0 : i32
    return %c0_i32, %c0_i32_0 : i32, i32
  }
  func.func @transform_9(%arg0: i32) -> (i32, i32) {
    %c0_i32 = arith.constant 0 : i32
    %c0_i32_0 = arith.constant 0 : i32
    return %arg0, %c0_i32 : i32, i32
  }
}

</mosaic_0001>

<bundles_post_ra>
// kernel: tpu_custom_call.1
= control target key start
LH: loop header
LB: loop body
LE: loop exit
PB: predicated region body
PF: predicated region fallthrough
CT: control target
= control target key end

     0   :  { %vm55_vm0 = vcmask 261120   ;;  %vm193_vm1 = vcmask 523264   ;;  %vm248_vm2 = vcmask 31744   ;;  %s459_s1 = inlined_call_operand.vmem [shape: bf16[32,128], index: 1, kind: input, shape index: {}]   ;;  %s460_s0 = inlined_call_operand.vmem [shape: f32[8,32], index: 0, kind: input, shape index: {}]   ;;  %s461_s3 = inlined_call_operand.vmem [shape: bf16[128,64], index: 3, kind: input, shape index: {}]   ;;  %s462_s2 = inlined_call_operand.vmem [shape: f32[1,128], index: 2, kind: input, shape index: {}]   ;;  %s463_s4 = inlined_call_operand.vmem [shape: f32[1,64], index: 4, kind: input, shape index: {}]   ;;  %s464_s5 = inlined_call_operand.vmem [shape: bf16[64,32], index: 5, kind: input, shape index: {}]   ;;  %s465_s6 = inlined_call_operand.vmem [shape: f32[1,32], index: 6, kind: input, shape index: {}]   ;;  %s466_s8 = inlined_call_operand.vmem [shape: f32[1,4], index: 8, kind: input, shape index: {}]   ;;  %s467_s7 = inlined_call_operand.vmem [shape: bf16[32,4], index: 7, kind: input, shape index: {}]   ;;  %s468_s9 = inlined_call_operand.vmem [shape: f32[8,4], index: 9, kind: output, shape index: {}]  }
   0x1   :  { %v322_v0 = vld [vmem:[%s459_s1 + $0x8] sm:$0xff]  ;;  %v330_v1 = vld [vmem:[%s461_s3 + $0x38] sm:$0xff]  ;;  %v321_v2 = vld [vmem:[%s459_s1] sm:$0xff] }
   0x2   :  { %65 = vmatpush.bf16.msra.mxu0 %v322_v0  ;;  %v33_v3 = vld [vmem:[%s460_s0] sm:$0xff]  ;;  %142 = vmatpush.bf16.msra.mxu1 %v330_v1  ;;  %v329_v4 = vld [vmem:[%s461_s3 + $0x30] sm:$0xff]  ;;  %v328_v6 = vld [vmem:[%s461_s3 + $0x28] sm:$0xff] }
   0x3   :  { %v34_v5 = vpack.c.bf16 %v33_v3, %v33_v3  ;;  %v327_v7 = vld [vmem:[%s461_s3 + $0x20] sm:$0xff]  ;;  %v326_v8 = vld [vmem:[%s461_s3 + $0x18] sm:$0xff]  ;;  %v325_v9 = vld [vmem:[%s461_s3 + $0x10] sm:$0xff] }
   0x4   :  { %v324_v10 = vld [vmem:[%s461_s3 + $0x8] sm:$0xff]  ;;  %v323_v11 = vld [vmem:[%s461_s3] sm:$0xff]  ;;  %v334_v12 = vld [vmem:[%s464_s5 + $0x18] sm:$0xff] }
   0x5   :  { %201 = vmatpush.bf16.msra.mxu2 %v334_v12  ;;  %v333_v13 = vld [vmem:[%s464_s5 + $0x10] sm:$0xff]  ;;  %v337_v14 = vld [vmem:[%s462_s2] ss:$0 sm:$0xff]  ;;  %v332_v20 = vld [vmem:[%s464_s5 + $0x8] sm:$0xff] }
   0x6   :  { %66 = vmatpush.bf16.msra.mxu0 %v321_v2  ;;  %143 = vmatpush.bf16.msra.mxu1 %v329_v4  ;;  %v331_v21 = vld [vmem:[%s464_s5] sm:$0xff]  ;;  %v336_v28 = vld [vmem:[%s467_s7 + $0x8] sm:$0xff] }
   0x7   :  { %v338_v22 = vld [vmem:[%s463_s4] ss:$0 sm:$0xff]  ;;  %241 = vmatpush.bf16.msra.mxu3 %v336_v28 }
   0x8   :  { %v335_v29 = vld [vmem:[%s467_s7] sm:$0xff] }
   0x9   :  { %262 = vmatmul.msk.bf16.vlgmr.msra.gmra.mxu0 %vm55_vm0, %v34_v5  ;;  %202 = vmatpush.bf16.msra.mxu2 %v333_v13  ;;  %v339_v30 = vld [vmem:[%s465_s6] ss:$0 sm:$0xff] }
   0xa   :  { %144 = vmatpush.bf16.msra.mxu1 %v328_v6  ;;  %v340_v36 = vld [vmem:[%s466_s8] ss:$0 sm:$0xff] }
   0xb   :  { %242 = vmatpush.bf16.msra.mxu3 %v335_v29 }
   0xd   :  { %203 = vmatpush.bf16.msra.mxu2 %v332_v20 }
   0xe   :  { %145 = vmatpush.bf16.msra.mxu1 %v327_v7 }
  0x11   :  { %204 = vmatpush.bf16.msra.mxu2 %v331_v21 }
  0x12   :  { %146 = vmatpush.bf16.msra.mxu1 %v326_v8 }
  0x16   :  { %147 = vmatpush.bf16.msra.mxu1 %v325_v9 }
  0x1a   :  { %148 = vmatpush.bf16.msra.mxu1 %v324_v10 }
  0x1e   :  { %149 = vmatpush.bf16.msra.mxu1 %v323_v11 }
  0x86   :  { %v68_v15 = vpop.f32.mrf.mxu0 }
  0x87   :  { %v69_v16 = vadd.f32 %v337_v14, %v68_v15 }
  0x89   :  { %v72_v17 = vmax.f32 %v69_v16, 0.0 }
  0x8b   :  { %v73_v18 = vpack.c.bf16 %v72_v17, %v72_v17 }
  0x8d   :  { %150 = vmatmul.bf16.vlgmr.msra.gmra.mxu1 %v73_v18 }
  0x8e   :  { %v70_v19 = vpop.f32.mrf.mxu0 }
 0x10a   :  { %v151_v23 = vpop.f32.mrf.mxu1 }
 0x10b   :  { %v152_v24 = vadd.f32 %v338_v22, %v151_v23 }
 0x10d   :  { %v155_v25 = vmax.f32 %v152_v24, 0.0 }
 0x10f   :  { %v156_v26 = vpack.c.bf16 %v155_v25, %v155_v25 }
 0x111   :  { %311 = vmatmul.msk.bf16.vlgmr.msra.gmra.mxu2 %vm193_vm1, %v156_v26 }
 0x112   :  { %v153_v27 = vpop.f32.mrf.mxu1 }
 0x194   :  { %v206_v31 = vpop.f32.mrf.mxu2 }
 0x195   :  { %v207_v32 = vadd.f32 %v339_v30, %v206_v31 }
 0x197   :  { %v210_v33 = vmax.f32 %v207_v32, 0.0 }
 0x199   :  { %v211_v34 = vpack.c.bf16 %v210_v33, %v210_v33 }
 0x19b   :  { %320 = vmatmul.msk.bf16.vlgmr.msra.gmra.mxu3 %vm55_vm0, %v211_v34 }
 0x19c   :  { %v208_v35 = vpop.f32.mrf.mxu2 }
 0x21e   :  { %v244_v37 = vpop.f32.mrf.mxu3 }
 0x21f   :  { %v245_v38 = vadd.f32 %v340_v36, %v244_v37 }
 0x221   :  { %249 = vst.msk [vmem:[%s468_s9] sm:$0xff] %vm248_vm2, %v245_v38 }
 0x226   :  { %v246_v39 = vpop.f32.mrf.mxu3 }

</bundles_post_ra>
